<compile_context>
chip_gen: v7x
topology: tpu7x:2x2x1
jax: 0.10.0
libtpu: 0.0.40
codegen_flags: <defaults>
</compile_context>

<pallas_src>
import functools
import math

import jax
import jax.numpy as jnp
from jax.experimental import pallas as pl
from jax.experimental.pallas import tpu as pltpu

_INV_SQRT2 = 0.7071067811865476
_SQRT_2_OVER_PI = 0.7978845608028654
_GELU_TANH_COEF = 0.044715


def _gelu_f32(h, approximate):
    if approximate:
        inner = _SQRT_2_OVER_PI * (h + _GELU_TANH_COEF * (h * h * h))
        return 0.5 * h * (1.0 + jnp.tanh(inner))
    return 0.5 * h * (1.0 + jax.lax.erf(h * _INV_SQRT2))


def _block_kernel(x_ref, w1_ref, b1_ref, w2_ref, bo_ref, wr_ref, o_ref, *, approximate):
    x = x_ref[...]                                            # (tn, Cin) natural layout
    # fc1: (tn, Cin) @ (Cin, H) -> (tn, H), f32 accumulate on the MXU.
    h = jnp.dot(x, w1_ref[...], preferred_element_type=jnp.float32) + b1_ref[...]
    h = _gelu_f32(h, approximate)                             # f32 activation math
    # dropout(p=0.0) == identity.
    # fc2: (tn, H) @ (H, Cout) -> (tn, Cout).
    y = jnp.dot(h.astype(w2_ref.dtype), w2_ref[...], preferred_element_type=jnp.float32)
    # residual_proj fused: (tn, Cin) @ (Cin, Cout)  (GIBLiUpStub: feat += residual).
    r = jnp.dot(x, wr_ref[...], preferred_element_type=jnp.float32)
    o_ref[...] = (y + r + bo_ref[...]).astype(o_ref.dtype)


def _round_up(v, m):
    return (v + m - 1) // m * m


def gibli_up_block_pallas(x, w1, b1, w2, b2, w_res, b_res, *,
                          approximate_gelu=True, tn_max=4096):
    """x: (..., Cin). w1: (Cin, H), b1: (H,), w2: (H, Cout), b2: (Cout,),
    w_res: (Cin, Cout), b_res: (Cout,).  Returns (..., Cout) in x.dtype."""
    *lead, cin = x.shape
    hidden = w1.shape[1]
    cout = w2.shape[1]
    n = math.prod(lead) if lead else 1

    x2 = x.reshape(n, cin)                        # contiguous reshape: no data movement
    b1r = b1.astype(jnp.float32).reshape(1, hidden)
    bor = (b2.astype(jnp.float32) + b_res.astype(jnp.float32)).reshape(1, cout)

    # Token tile: big enough to amortize the ~0.35us/step pipeline overhead, small
    # enough for VMEM (~2-3 KiB/token f32 incl. double-buffered I/O and the (tn, H)
    # GELU intermediate => ~12 MiB at tn=4096, under v7x's 32 MiB scoped / 64 MiB
    # physical VMEM), and <= ~n/2 so v7x's two TensorCores both get grid steps.
    tn_max = max(256, (int(tn_max) // 256) * 256)  # keep tn a multiple of 256
    if n <= 1024:
        tn = n                                    # single full-extent block (legal layout)
    else:
        tn = min(tn_max, _round_up(pl.cdiv(n, 2), 256))
    grid = (pl.cdiv(n, tn),)                      # non-divisible tail -> masked last block

    itemsize = jnp.dtype(x.dtype).itemsize
    cost = pl.CostEstimate(
        flops=2 * n * (cin * hidden + hidden * cout + cin * cout) + 10 * n * hidden,
        transcendentals=n * hidden,
        bytes_accessed=n * (cin + cout) * itemsize
        + (cin * hidden + hidden * cout + cin * cout) * jnp.dtype(w1.dtype).itemsize
        + (hidden + cout) * 4,
    )

    out2 = pl.pallas_call(
        functools.partial(_block_kernel, approximate=approximate_gelu),
        out_shape=jax.ShapeDtypeStruct((n, cout), x.dtype),
        grid_spec=pltpu.PrefetchScalarGridSpec(
            num_scalar_prefetch=0,
            grid=grid,
            in_specs=[
                pl.BlockSpec((tn, cin), lambda i: (i, 0)),        # x tile (streamed)
                pl.BlockSpec((cin, hidden), lambda i: (0, 0)),    # W1        (resident)
                pl.BlockSpec((1, hidden), lambda i: (0, 0)),      # b1        (resident)
                pl.BlockSpec((hidden, cout), lambda i: (0, 0)),   # W2        (resident)
                pl.BlockSpec((1, cout), lambda i: (0, 0)),        # b2+b_res  (resident)
                pl.BlockSpec((cin, cout), lambda i: (0, 0)),      # W_res     (resident)
            ],
            out_specs=pl.BlockSpec((tn, cout), lambda i: (i, 0)), # y tile (natural layout)
        ),
        compiler_params=pltpu.CompilerParams(
            dimension_semantics=("parallel",),
            vmem_limit_bytes=32 * 1024 * 1024,
        ),
        cost_estimate=cost,
    )(x2, w1, b1r, w2, bor, w_res)

    return out2.reshape(*lead, cout)


def _reference(x, w1, b1, w2, b2, w_res, b_res, approximate):
    xf = x.astype(jnp.float32)
    h = xf @ w1.astype(jnp.float32) + b1.astype(jnp.float32)
    h = _gelu_f32(h, approximate)
    y = h @ w2.astype(jnp.float32) + b2.astype(jnp.float32)
    r = xf @ w_res.astype(jnp.float32) + b_res.astype(jnp.float32)
    return y + r


if __name__ == "__main__":
    # GIBLiUpStub config stand-in: unpool_out_channels=32, concat=True -> f_channels=64,
    # block hidden=128, sota out_channels=32 -> residual_proj = nn.Linear(64, 32).
    f_channels, hidden, out_channels = 64, 128, 32

    key = jax.random.PRNGKey(0)
    kw1, kb1, kw2, kb2, kwr, kbr, kx, kx2 = jax.random.split(key, 8)

    # Deterministic init in torch.nn.Linear's default uniform range.
    bound1 = 1.0 / math.sqrt(f_channels)
    w1 = jax.random.uniform(kw1, (f_channels, hidden), minval=-bound1, maxval=bound1,
                            dtype=jnp.float32)
    b1 = jax.random.uniform(kb1, (hidden,), minval=-bound1, maxval=bound1,
                            dtype=jnp.float32)
    bound2 = 1.0 / math.sqrt(hidden)
    w2 = jax.random.uniform(kw2, (hidden, out_channels), minval=-bound2, maxval=bound2,
                            dtype=jnp.float32)
    b2 = jax.random.uniform(kb2, (out_channels,), minval=-bound2, maxval=bound2,
                            dtype=jnp.float32)
    w_res = jax.random.uniform(kwr, (f_channels, out_channels), minval=-bound1,
                               maxval=bound1, dtype=jnp.float32)
    b_res = jax.random.uniform(kbr, (out_channels,), minval=-bound1, maxval=bound1,
                               dtype=jnp.float32)

    # Small shape (batch=2, 8 points): exact erf GELU path (torch.nn.GELU() numerics).
    x = jax.random.normal(kx, (2, 8, f_channels), dtype=jnp.float32)
    out = jax.block_until_ready(
        gibli_up_block_pallas(x, w1, b1, w2, b2, w_res, b_res, approximate_gelu=False))
    ref = _reference(x, w1, b1, w2, b2, w_res, b_res, approximate=False)
    assert out.shape == (2, 8, out_channels)
    assert jnp.allclose(out, ref, atol=1e-4, rtol=1e-4)

    # Larger ragged token count: multi-step "parallel" grid + masked non-divisible tail,
    # tanh (EUP) GELU fast path.
    x_big = jax.random.normal(kx2, (4, 650, f_channels), dtype=jnp.float32)
    out_big = jax.block_until_ready(
        gibli_up_block_pallas(x_big, w1, b1, w2, b2, w_res, b_res,
                              approximate_gelu=True, tn_max=1024))
    ref_big = _reference(x_big, w1, b1, w2, b2, w_res, b_res, approximate=True)
    assert out_big.shape == (4, 650, out_channels)
    assert jnp.allclose(out_big, ref_big, atol=1e-3, rtol=1e-3)

    # bf16 activations + weights at the HBM boundary (halves DMA traffic on this
    # memory-bound kernel); f32 MXU accumulation and f32 GELU math retained in-kernel.
    out_bf16 = jax.block_until_ready(
        gibli_up_block_pallas(x_big.astype(jnp.bfloat16),
                              w1.astype(jnp.bfloat16), b1,
                              w2.astype(jnp.bfloat16), b2,
                              w_res.astype(jnp.bfloat16), b_res,
                              approximate_gelu=True))
    assert out_bf16.dtype == jnp.bfloat16
    assert jnp.allclose(out_bf16.astype(jnp.float32), ref_big, atol=1e-1, rtol=1e-1)

    print("KERNEL_OK")
</pallas_src>

<mosaic_0001>
module attributes {stable_mosaic.version = 11 : i64} {
  func.func @_block_kernel(%arg0: i32, %arg1: memref<16x64xf32, #tpu.memory_space<vmem>>, %arg2: memref<64x128xf32, #tpu.memory_space<vmem>>, %arg3: memref<1x128xf32, #tpu.memory_space<vmem>>, %arg4: memref<128x32xf32, #tpu.memory_space<vmem>>, %arg5: memref<1x32xf32, #tpu.memory_space<vmem>>, %arg6: memref<64x32xf32, #tpu.memory_space<vmem>>, %arg7: memref<16x32xf32, #tpu.memory_space<vmem>>) attributes {dimension_semantics = [#tpu.dimension_semantics<parallel>], iteration_bounds = array<i64: 1>, scalar_prefetch = 0 : i64, scratch_operands = 0 : i64, tpu.core_type = #tpu.core_type<tc>, window_params = [{transform_indices = @transform_0, window_bounds = array<i64: 16, 64>}, {pipeline_mode = #tpu.pipeline_mode<synchronous>, transform_indices = @transform_1, window_bounds = array<i64: 64, 128>}, {pipeline_mode = #tpu.pipeline_mode<synchronous>, transform_indices = @transform_2, window_bounds = array<i64: 1, 128>}, {pipeline_mode = #tpu.pipeline_mode<synchronous>, transform_indices = @transform_3, window_bounds = array<i64: 128, 32>}, {pipeline_mode = #tpu.pipeline_mode<synchronous>, transform_indices = @transform_4, window_bounds = array<i64: 1, 32>}, {pipeline_mode = #tpu.pipeline_mode<synchronous>, transform_indices = @transform_5, window_bounds = array<i64: 64, 32>}, {transform_indices = @transform_6, window_bounds = array<i64: 16, 32>}]} {
    %c0 = arith.constant 0 : index
    %c0_0 = arith.constant 0 : index
    %0 = vector.load %arg1[%c0, %c0_0] : memref<16x64xf32, #tpu.memory_space<vmem>>, vector<16x64xf32>
    %c0_1 = arith.constant 0 : index
    %c0_2 = arith.constant 0 : index
    %1 = vector.load %arg2[%c0_1, %c0_2] : memref<64x128xf32, #tpu.memory_space<vmem>>, vector<64x128xf32>
    %cst = arith.constant dense<0.000000e+00> : vector<16x128xf32>
    %2 = tpu.matmul %0, %1, %cst {dimension_numbers = #tpu.dot_dimension_numbers<[1], [0], [0], [1], [0, 0, 1, 1], [], []>} : vector<16x64xf32>, vector<64x128xf32>, vector<16x128xf32> -> vector<16x128xf32>
    %c0_3 = arith.constant 0 : index
    %c0_4 = arith.constant 0 : index
    %3 = vector.load %arg3[%c0_3, %c0_4] : memref<1x128xf32, #tpu.memory_space<vmem>>, vector<1x128xf32>
    %4 = vector.broadcast %3 : vector<1x128xf32> to vector<16x128xf32>
    %5 = arith.addf %2, %4 : vector<16x128xf32>
    %cst_5 = arith.constant 5.000000e-01 : f32
    %6 = vector.broadcast %cst_5 : f32 to vector<16x128xf32>
    %7 = arith.mulf %6, %5 : vector<16x128xf32>
    %cst_6 = arith.constant 0.707106769 : f32
    %8 = vector.broadcast %cst_6 : f32 to vector<16x128xf32>
    %9 = arith.mulf %5, %8 : vector<16x128xf32>
    %10 = math.erf %9 : vector<16x128xf32>
    %cst_7 = arith.constant 1.000000e+00 : f32
    %11 = vector.broadcast %cst_7 : f32 to vector<16x128xf32>
    %12 = arith.addf %11, %10 : vector<16x128xf32>
    %13 = arith.mulf %7, %12 : vector<16x128xf32>
    %c0_8 = arith.constant 0 : index
    %c0_9 = arith.constant 0 : index
    %14 = vector.load %arg4[%c0_8, %c0_9] : memref<128x32xf32, #tpu.memory_space<vmem>>, vector<128x32xf32>
    %cst_10 = arith.constant dense<0.000000e+00> : vector<16x32xf32>
    %15 = tpu.matmul %13, %14, %cst_10 {dimension_numbers = #tpu.dot_dimension_numbers<[1], [0], [0], [1], [0, 0, 1, 1], [], []>} : vector<16x128xf32>, vector<128x32xf32>, vector<16x32xf32> -> vector<16x32xf32>
    %c0_11 = arith.constant 0 : index
    %c0_12 = arith.constant 0 : index
    %16 = vector.load %arg6[%c0_11, %c0_12] : memref<64x32xf32, #tpu.memory_space<vmem>>, vector<64x32xf32>
    %cst_13 = arith.constant dense<0.000000e+00> : vector<16x32xf32>
    %17 = tpu.matmul %0, %16, %cst_13 {dimension_numbers = #tpu.dot_dimension_numbers<[1], [0], [0], [1], [0, 0, 1, 1], [], []>} : vector<16x64xf32>, vector<64x32xf32>, vector<16x32xf32> -> vector<16x32xf32>
    %18 = arith.addf %15, %17 : vector<16x32xf32>
    %c0_14 = arith.constant 0 : index
    %c0_15 = arith.constant 0 : index
    %19 = vector.load %arg5[%c0_14, %c0_15] : memref<1x32xf32, #tpu.memory_space<vmem>>, vector<1x32xf32>
    %20 = vector.broadcast %19 : vector<1x32xf32> to vector<16x32xf32>
    %21 = arith.addf %18, %20 : vector<16x32xf32>
    %c0_16 = arith.constant 0 : index
    %c0_17 = arith.constant 0 : index
    %22 = vector.load %arg7[%c0_16, %c0_17] : memref<16x32xf32, #tpu.memory_space<vmem>>, vector<16x32xf32>
    tpu.vector_store %arg7[%c0_16, %c0_17], %21 {strides = array<i32>} : memref<16x32xf32, #tpu.memory_space<vmem>>, vector<16x32xf32>,
    return
  }
  func.func @transform_0(%arg0: i32) -> (i32, i32) {
    %c0_i32 = arith.constant 0 : i32
    %c0_i32_0 = arith.constant 0 : i32
    return %arg0, %c0_i32 : i32, i32
  }
  func.func @transform_1(%arg0: i32) -> (i32, i32) {
    %c0_i32 = arith.constant 0 : i32
    %c0_i32_0 = arith.constant 0 : i32
    %c0_i32_1 = arith.constant 0 : i32
    return %c0_i32, %c0_i32_0 : i32, i32
  }
  func.func @transform_2(%arg0: i32) -> (i32, i32) {
    %c0_i32 = arith.constant 0 : i32
    %c0_i32_0 = arith.constant 0 : i32
    %c0_i32_1 = arith.constant 0 : i32
    return %c0_i32, %c0_i32_0 : i32, i32
  }
  func.func @transform_3(%arg0: i32) -> (i32, i32) {
    %c0_i32 = arith.constant 0 : i32
    %c0_i32_0 = arith.constant 0 : i32
    %c0_i32_1 = arith.constant 0 : i32
    return %c0_i32, %c0_i32_0 : i32, i32
  }
  func.func @transform_4(%arg0: i32) -> (i32, i32) {
    %c0_i32 = arith.constant 0 : i32
    %c0_i32_0 = arith.constant 0 : i32
    %c0_i32_1 = arith.constant 0 : i32
    return %c0_i32, %c0_i32_0 : i32, i32
  }
  func.func @transform_5(%arg0: i32) -> (i32, i32) {
    %c0_i32 = arith.constant 0 : i32
    %c0_i32_0 = arith.constant 0 : i32
    %c0_i32_1 = arith.constant 0 : i32
    return %c0_i32, %c0_i32_0 : i32, i32
  }
  func.func @transform_6(%arg0: i32) -> (i32, i32) {
    %c0_i32 = arith.constant 0 : i32
    %c0_i32_0 = arith.constant 0 : i32
    return %arg0, %c0_i32 : i32, i32
  }
}

</mosaic_0001>

<bundles_post_ra>
// kernel: tpu_custom_call.1
= control target key start
LH: loop header
LB: loop body
LE: loop exit
PB: predicated region body
PF: predicated region fallthrough
CT: control target
= control target key end

     0   :  { %vm41_vm0 = vcmask 523264   ;;  %s711_s0 = inlined_call_operand.vmem [shape: f32[16,64], index: 0, kind: input, shape index: {}]   ;;  %s712_s1 = inlined_call_operand.vmem [shape: f32[64,128], index: 1, kind: input, shape index: {}]   ;;  %s713_s2 = inlined_call_operand.vmem [shape: f32[1,128], index: 2, kind: input, shape index: {}]   ;;  %s714_s3 = inlined_call_operand.vmem [shape: f32[128,32], index: 3, kind: input, shape index: {}]   ;;  %s715_s4 = inlined_call_operand.vmem [shape: f32[1,32], index: 4, kind: input, shape index: {}]   ;;  %s716_s5 = inlined_call_operand.vmem [shape: f32[64,32], index: 5, kind: input, shape index: {}]   ;;  %s717_s6 = inlined_call_operand.hbm [shape: f32[16,32], index: 6, kind: output, shape index: {}]  }
   0x1   :  { %v26_v0 = vld [vmem:[%s712_s1] sm:$0xff]  ;;  %v27_v1 = vld [vmem:[%s712_s1 + $0x8] sm:$0xff]  ;;  %v28_v2 = vld [vmem:[%s712_s1 + $0x10] sm:$0xff] }
   0x2   :  { %v452_v3 = vpack.c.bf16 %v27_v1, %v26_v0  ;;  %v29_v4 = vld [vmem:[%s712_s1 + $0x18] sm:$0xff]  ;;  %v30_v6 = vld [vmem:[%s712_s1 + $0x20] sm:$0xff]  ;;  %v31_v7 = vld [vmem:[%s712_s1 + $0x28] sm:$0xff] }
   0x3   :  { %v456_v5 = vpack.c.bf16 %v29_v4, %v28_v2  ;;  %v24_v8 = vld [vmem:[%s711_s0] sm:$0xff]  ;;  %v134_v10 = vld [vmem:[%s714_s3 + $0x8] sm:$0xff]  ;;  %v135_v12 = vld [vmem:[%s714_s3 + $0x10] sm:$0xff]  ;;  %v460_v14 = vpack.c.bf16 %v31_v7, %v30_v6 }
   0x4   :  { %453 = vmatprep.subr.bf16.mxu0 %v452_v3  ;;  %395 = vmatprep.mubr.msk.f32.mxu0 %vm41_vm0, %v24_v8  ;;  %v133_v9 = vld [vmem:[%s714_s3] sm:$0xff]  ;;  %v136_v13 = vld [vmem:[%s714_s3 + $0x18] sm:$0xff]  ;;  %v138_v17 = vld [vmem:[%s714_s3 + $0x28] sm:$0xff] }
   0x5   :  { %455 = vmatpush3.bf16.msra.mxu0 %v452_v3  ;;  %v484_v11 = vpack.c.bf16 %v134_v10, %v133_v9  ;;  %v488_v15 = vpack.c.bf16 %v136_v13, %v135_v12  ;;  %v137_v16 = vld [vmem:[%s714_s3 + $0x20] sm:$0xff] }
   0x6   :  { %457 = vmatprep.subr.bf16.mxu0 %v456_v5 }
   0x7   :  { %11 = vsyncpa [#allocation3], 0  ;;  %v32_v18 = vld [vmem:[%s712_s1 + $0x30] sm:$0xff]  ;;  %v33_v19 = vld [vmem:[%s712_s1 + $0x38] sm:$0xff]  ;;  %485 = vmatprep.subr.bf16.mxu1 %v484_v11  ;;  %v492_v20 = vpack.c.bf16 %v138_v17, %v137_v16  ;;  %vm316_vm1 = vcmask 261120  }
   0x8   :  { %487 = vmatpush3.bf16.msra.mxu1 %v484_v11  ;;  %v464_v21 = vpack.c.bf16 %v33_v19, %v32_v18  ;;  %v25_v22 = vld [vmem:[%s711_s0 + $0x8] sm:$0xff]  ;;  %v139_v23 = vld [vmem:[%s714_s3 + $0x30] sm:$0xff]  ;;  %v140_v24 = vld [vmem:[%s714_s3 + $0x38] sm:$0xff] }
   0x9   :  { %459 = vmatpush3.bf16.msra.mxu0 %v456_v5  ;;  %489 = vmatprep.subr.bf16.mxu1 %v488_v15  ;;  %v496_v25 = vpack.c.bf16 %v140_v24, %v139_v23  ;;  %v149_v26 = vld [vmem:[%s716_s5] sm:$0xff]  ;;  %v150_v27 = vld [vmem:[%s716_s5 + $0x8] sm:$0xff]  ;;  %v151_v32 = vld [vmem:[%s716_s5 + $0x10] sm:$0xff] }
   0xa   :  { %461 = vmatprep.subr.bf16.mxu0 %v460_v14  ;;  %v468_v28 = vpack.c.bf16 %v150_v27, %v149_v26  ;;  %v141_v29 = vld [vmem:[%s714_s3 + $0x40] sm:$0xff]  ;;  %v142_v30 = vld [vmem:[%s714_s3 + $0x48] sm:$0xff]  ;;  %v152_v33 = vld [vmem:[%s716_s5 + $0x18] sm:$0xff] }
   0xb   :  { %v500_v31 = vpack.c.bf16 %v142_v30, %v141_v29  ;;  %v472_v34 = vpack.c.bf16 %v152_v33, %v151_v32  ;;  %v143_v35 = vld [vmem:[%s714_s3 + $0x50] sm:$0xff]  ;;  %v144_v36 = vld [vmem:[%s714_s3 + $0x58] sm:$0xff]  ;;  %v153_v38 = vld [vmem:[%s716_s5 + $0x20] sm:$0xff] }
   0xc   :  { %491 = vmatpush3.bf16.msra.mxu1 %v488_v15  ;;  %v504_v37 = vpack.c.bf16 %v144_v36, %v143_v35  ;;  %v154_v39 = vld [vmem:[%s716_s5 + $0x28] sm:$0xff]  ;;  %v145_v41 = vld [vmem:[%s714_s3 + $0x60] sm:$0xff]  ;;  %v155_v44 = vld [vmem:[%s716_s5 + $0x30] sm:$0xff] }
   0xd   :  { %463 = vmatpush3.bf16.msra.mxu0 %v460_v14  ;;  %493 = vmatprep.subr.bf16.mxu1 %v492_v20  ;;  %v476_v40 = vpack.c.bf16 %v154_v39, %v153_v38  ;;  %v146_v42 = vld [vmem:[%s714_s3 + $0x68] sm:$0xff]  ;;  %v156_v45 = vld [vmem:[%s716_s5 + $0x38] sm:$0xff]  ;;  %v147_v47 = vld [vmem:[%s714_s3 + $0x70] sm:$0xff]  ;;  %s549_s5 = smov [#allocation2]  }
   0xe   :  { %465 = vmatprep.subr.bf16.mxu0 %v464_v21  ;;  %v508_v43 = vpack.c.bf16 %v146_v42, %v145_v41  ;;  %v480_v46 = vpack.c.bf16 %v156_v45, %v155_v44  ;;  %v148_v48 = vld [vmem:[%s714_s3 + $0x78] sm:$0xff]  ;;  %v335_v50 = vld [vmem:[%s713_s2] ss:$0 sm:$0xff]  ;;  %s324_s15 = sshll.u32 %s549_s5, 4  ;;  %s325_s15 = int_to_ptr.vmem [resolvable:$true] %s324_s15 }
   0xf   :  { %v512_v49 = vpack.c.bf16 %v148_v48, %v147_v47  ;;  %v340_v4 = vld [vmem:[%s715_s4] ss:$0 sm:$0xff]  ;;  %s525_s16 = scalar_lea.vmem %s325_s15, 256  ;;  %p530_p1 = scmp.lt.s32.totalorder %s325_s15, %s325_s15 }
  0x10   :  { %495 = vmatpush3.bf16.msra.mxu1 %v492_v20  ;;  %p526_p0 = scmp.ne.s32.totalorder %s325_s15, %s525_s16  ;;  %p531_p2 = scmp.lt.s32.totalorder %s525_s16, %s525_s16 }
  0x11   :  { %467 = vmatpush3.bf16.msra.mxu0 %v464_v21  ;;  %497 = vmatprep.subr.bf16.mxu1 %v496_v25 }
  0x12   :  { %469 = vmatprep.subr.bf16.mxu0 %v468_v28  ;;  %p532_p3 = por %p531_p2, %p530_p1 }
  0x14   :  { %396 = vmatmul.mubr.msk.f32.vlgmr.msra.gmra.mrb[0].mxu0 %vm41_vm0, %v25_v22  ;;  %499 = vmatpush3.bf16.msra.mxu1 %v496_v25  ;;  %p533_p4 = pnand %p532_p3, %p526_p0 }
  0x15   :  { %414 = vmatprep.mubr.msk.f32.mxu0 %vm41_vm0, %v24_v8  ;;  %471 = vmatpush3.bf16.msra.mxu0 %v468_v28 }
  0x16   :  { %501 = vmatprep.subr.bf16.mxu1 %v500_v31  ;;  %473 = vmatprep.subr.bf16.mxu0 %v472_v34 }
  0x18   :  { %503 = vmatpush3.bf16.msra.mxu1 %v500_v31 }
  0x19   :  { %475 = vmatpush3.bf16.msra.mxu0 %v472_v34  ;;  %505 = vmatprep.subr.bf16.mxu1 %v504_v37 }
  0x1a   :  { %477 = vmatprep.subr.bf16.mxu0 %v476_v40 }
  0x1c   :  { %507 = vmatpush3.bf16.msra.mxu1 %v504_v37 }
  0x1d   :  { %479 = vmatpush3.bf16.msra.mxu0 %v476_v40  ;;  %509 = vmatprep.subr.bf16.mxu1 %v508_v43 }
  0x1e   :  { %481 = vmatprep.subr.bf16.mxu0 %v480_v46 }
  0x20   :  { %511 = vmatpush3.bf16.msra.mxu1 %v508_v43 }
  0x21   :  { %483 = vmatpush3.bf16.msra.mxu0 %v480_v46  ;;  %513 = vmatprep.subr.bf16.mxu1 %v512_v49 }
  0x24   :  { %515 = vmatpush3.bf16.msra.mxu1 %v512_v49  ;;  %415 = vmatmul.mubr.msk.f32.vlgmr.msra.gmra.mrb[2].mxu0 %vm41_vm0, %v25_v22 }
  0xe7   :  { %v397_v51 = vpop.f32.mrb[0].mxu0 }
  0xe8   :  { %v120_v52 = vadd.f32 %v397_v51, %v335_v50  ;;  %v114_v53 = vpop.f32.mrb[1].mxu0 }
  0xe9   :  { %v115_v54 = vadd.f32 %v335_v50, %v114_v53 }
  0xea   :  { %v126_v55 = vmul.f32 0.70710677, %v120_v52  ;;  %v124_v62 = vmul.f32 0.5, %v120_v52 }
  0xeb   :  { %v125_v56 = vmul.f32 0.70710677, %v115_v54  ;;  %v123_v60 = vmul.f32 0.5, %v115_v54 }
  0xec   :  { %521 = verf.f32 %v126_v55 }
  0xed   :  { %523 = verf.f32 %v125_v56 }
  0xf6   :  { %v522_v57 = vpop.eup %521 }
  0xf7   :  { %v524_v58 = vpop.eup %523  ;;  %v130_v59 = vadd.f32 1.0, %v522_v57  ;;  %v416_v1 = vpop.f32.mrb[2].mxu0 }
  0xf8   :  { %v129_v61 = vadd.f32 1.0, %v524_v58  ;;  %v223_v2 = vpop.f32.mrb[3].mxu0 }
  0xf9   :  { %v132_v0 = vmul.f32 %v130_v59, %v124_v62 }
  0xfa   :  { %v131_v63 = vmul.f32 %v129_v61, %v123_v60 }
  0xfc   :  { %449 = vmatprep.mubr.f32.mxu1 %v131_v63 }
  0xfd   :  { %450 = vmatmul.mubr.f32.vlgmr.msra.gmra.mrb[0].mxu1 %v132_v0 }
 0x1d0   :  { %v451_v3 = vpop.f32.mrb[0].mxu1 }
 0x1d1   :  { %v304_v5 = vadd.f32 %v451_v3, %v416_v1  ;;  %v298_v6 = vpop.f32.mrb[1].mxu1 }
 0x1d2   :  { %v299_v7 = vadd.f32 %v298_v6, %v223_v2 }
 0x1d3   :  { %v315_v8 = vadd.f32 %v340_v4, %v304_v5 }
 0x1d4   :  { %v314_v9 = vadd.f32 %v340_v4, %v299_v7 }
 0x1d5   :  { %318 = vst.msk [vmem:[#allocation2 + $0x8] sm:$0xff] %vm316_vm1, %v315_v8 }
 0x1d6   :  { %317 = vst.msk [vmem:[#allocation2] sm:$0xff] %vm316_vm1, %v314_v9 }
 0x1d7   :  { %536 = shalt.err (!%p533_p4)
}
 0x1d8   :  { %s537_s18 = scalar_lea.hbm %s717_s6, 256 }
 0x1d9   :  { %p538_p5 = scmp.ne.s32.totalorder %s717_s6, %s537_s18  ;;  %p541_p6 = scmp.lt.u32.totalorder %s537_s18, %s717_s6 }
 0x1db   :  { %p543_p7 = pnand %p541_p6, %p538_p5 }
 0x1dd   :  { %546 = shalt.err (!%p543_p7)
}
 0x1de   :  { %s550_s23 = smov 128   ;;  %s551_s24 = smov 8  }
 0x1df   :  { %330 = dma.vmem_to_hbm [thread:$0]  %s325_s15, 256, %s717_s6, [#allocation3], %s550_s23, %s550_s23, %s551_s24  }
 0x1e0   :  { %547 = dma.done.wait [#allocation3], 256  }
 0x1e1   :  { %548 = vsyncadd [#allocation3], 4294967040 }
 0x1e2   :  { %334 = vsyncpa [#allocation3], 1 }

</bundles_post_ra>
